<compile_context>
chip_gen: v6e
topology: v6e:2x2x1
jax: 0.10.0
libtpu: 0.0.40
codegen_flags: <defaults>
</compile_context>

<pallas_src>
import jax
import jax.numpy as jnp
from jax.experimental import pallas as pl
from jax.experimental.pallas import tpu as pltpu

NEG_SLOPE = 0.01  # PyTorch nn.LeakyReLU default


def _leaky_relu(h):
    return jnp.where(h > 0, h, NEG_SLOPE * h)


def mlp_kernel(xT_ref,
               w1_ref, b1_ref,
               w2_ref, b2_ref,
               w3_ref, b3_ref,
               w4_ref, b4_ref,
               oT_ref):
    # Feature-major math: (F_out, F_in) @ (F_in, tb) -> (F_out, tb).
    # Batch is the lane axis everywhere -> all loads/stores are lane-dense.
    h = xT_ref[...]
    h = _leaky_relu(
        jnp.dot(w1_ref[...], h, preferred_element_type=jnp.float32) + b1_ref[...])
    h = _leaky_relu(
        jnp.dot(w2_ref[...], h, preferred_element_type=jnp.float32) + b2_ref[...])
    h = _leaky_relu(
        jnp.dot(w3_ref[...], h, preferred_element_type=jnp.float32) + b3_ref[...])
    h = jnp.dot(w4_ref[...], h, preferred_element_type=jnp.float32) + b4_ref[...]
    oT_ref[...] = h.astype(oT_ref.dtype)


def _pick_batch_tile(B):
    # Lane-dense tiles (multiple of 128); aim for several grid steps so the
    # x/out DMAs pipeline under compute, capped at 2048 rows (VMEM use per
    # tile is then < 1 MiB even counting the f32 (64, tb) intermediate, well
    # inside v7x's 64 MiB physical / 32 MiB scoped VMEM).
    return 128 * max(1, min(16, B // (8 * 128)))


def fitter_forward(x, params, *, batch_tile=None, min_pallas_batch=256):
    """Forward pass of `fitter`.  x: (B, 4) float32 -> (B, 2) float32."""
    B, Fin = x.shape
    assert Fin == 4

    # Small-batch fast path: one pallas_call's fixed overhead dwarfs the work;
    # let XLA fuse the plain version instead.
    if B < min_pallas_batch:
        return reference_forward(x, params)

    tb = _pick_batch_tile(B) if batch_tile is None else batch_tile
    assert tb % 128 == 0, "batch tile must be lane-dense (multiple of 128)"

    n_steps = -(-B // tb)          # ceil-div: ragged batches are zero-padded
    B_pad = n_steps * tb

    xT = x.T                        # (4, B): cheap layout plumbing
    if B_pad != B:
        xT = jnp.pad(xT, ((0, 0), (0, B_pad - B)))

    w1, b1 = params["w1"], params["b1"]
    w2, b2 = params["w2"], params["b2"]
    w3, b3 = params["w3"], params["b3"]
    w4, b4 = params["w4"], params["b4"]

    def resident(a):
        # Whole (tiny) array at every grid point; constant index_map means
        # Pallas DMAs it once and it stays VMEM-resident across the grid.
        return pl.BlockSpec(a.shape, lambda i: (0, 0))

    outT = pl.pallas_call(
        mlp_kernel,
        out_shape=jax.ShapeDtypeStruct((w4.shape[0], B_pad), x.dtype),
        grid_spec=pltpu.PrefetchScalarGridSpec(
            num_scalar_prefetch=0,
            grid=(n_steps,),
            in_specs=[
                pl.BlockSpec((Fin, tb), lambda i: (0, i)),   # x^T batch tile
                resident(w1), resident(b1),
                resident(w2), resident(b2),
                resident(w3), resident(b3),
                resident(w4), resident(b4),
            ],
            out_specs=pl.BlockSpec((w4.shape[0], tb), lambda i: (0, i)),
        ),
        compiler_params=pltpu.CompilerParams(
            dimension_semantics=("parallel",)),   # shards steps across v7x TCs
    )(xT, w1, b1, w2, b2, w3, b3, w4, b4)

    return outT[:, :B].T


def init_params(key):
    """PyTorch Linear default init: U[-1/sqrt(fan_in), +1/sqrt(fan_in)].

    Weights kept in PyTorch (F_out, F_in) layout; biases as (F_out, 1)
    columns so they broadcast along the lane (batch) axis in the kernel.
    """
    dims = [(4, 32), (32, 64), (64, 32), (32, 2)]
    params = {}
    for idx, (fin, fout) in enumerate(dims, start=1):
        key, kw, kb = jax.random.split(key, 3)
        bound = 1.0 / float(fin) ** 0.5
        params[f"w{idx}"] = jax.random.uniform(
            kw, (fout, fin), jnp.float32, -bound, bound)
        params[f"b{idx}"] = jax.random.uniform(
            kb, (fout, 1), jnp.float32, -bound, bound)
    return params


def reference_forward(x, params):
    h = x
    for idx in range(1, 5):
        w, b = params[f"w{idx}"], params[f"b{idx}"]
        h = jnp.dot(h, w.T, precision=jax.lax.Precision.HIGHEST) + b.T
        if idx < 4:
            h = _leaky_relu(h)
    return h


if __name__ == "__main__":
    key = jax.random.PRNGKey(0)
    kx, kp = jax.random.split(key)
    params = init_params(kp)

    # Moderate batch: exercises the Pallas path with lane-dense tiles and a
    # 4-step grid (tb=128) -> pipelined DMAs, both v7x TensorCores busy.
    B = 512
    x = jax.random.normal(kx, (B, 4), dtype=jnp.float32)
    out = jax.block_until_ready(fitter_forward(x, params, batch_tile=128))
    ref = reference_forward(x, params)
    assert out.shape == (B, 2), out.shape
    err = float(jnp.max(jnp.abs(out - ref)))
    assert err < 1e-4, f"max abs err {err}"

    # Ragged batch goes through the kernel via zero-padding of the lane axis.
    x_rag = x[:300]
    out_rag = jax.block_until_ready(
        fitter_forward(x_rag, params, min_pallas_batch=1))
    assert out_rag.shape == (300, 2), out_rag.shape
    err_rag = float(jnp.max(jnp.abs(out_rag - reference_forward(x_rag, params))))
    assert err_rag < 1e-4, f"max abs err (ragged) {err_rag}"

    # Tiny batch takes the XLA fast path (kernel overhead not worth it).
    x_small = x[:8]
    out_small = jax.block_until_ready(fitter_forward(x_small, params))
    assert out_small.shape == (8, 2), out_small.shape
    err_small = float(jnp.max(jnp.abs(out_small - reference_forward(x_small, params))))
    assert err_small < 1e-5, f"max abs err (small) {err_small}"

    print("KERNEL_OK")
</pallas_src>

<mosaic_0001>
module attributes {stable_mosaic.version = 11 : i64} {
  func.func @mlp_kernel(%arg0: i32, %arg1: memref<4x128xf32, #tpu.memory_space<vmem>>, %arg2: memref<32x4xf32, #tpu.memory_space<vmem>>, %arg3: memref<32x1xf32, #tpu.memory_space<vmem>>, %arg4: memref<64x32xf32, #tpu.memory_space<vmem>>, %arg5: memref<64x1xf32, #tpu.memory_space<vmem>>, %arg6: memref<32x64xf32, #tpu.memory_space<vmem>>, %arg7: memref<32x1xf32, #tpu.memory_space<vmem>>, %arg8: memref<2x32xf32, #tpu.memory_space<vmem>>, %arg9: memref<2x1xf32, #tpu.memory_space<vmem>>, %arg10: memref<2x128xf32, #tpu.memory_space<vmem>>) attributes {dimension_semantics = [#tpu.dimension_semantics<parallel>], iteration_bounds = array<i64: 4>, scalar_prefetch = 0 : i64, scratch_operands = 0 : i64, tpu.core_type = #tpu.core_type<tc>, window_params = [{transform_indices = @transform_0, window_bounds = array<i64: 4, 128>}, {pipeline_mode = #tpu.pipeline_mode<synchronous>, transform_indices = @transform_1, window_bounds = array<i64: 32, 4>}, {pipeline_mode = #tpu.pipeline_mode<synchronous>, transform_indices = @transform_2, window_bounds = array<i64: 32, 1>}, {pipeline_mode = #tpu.pipeline_mode<synchronous>, transform_indices = @transform_3, window_bounds = array<i64: 64, 32>}, {pipeline_mode = #tpu.pipeline_mode<synchronous>, transform_indices = @transform_4, window_bounds = array<i64: 64, 1>}, {pipeline_mode = #tpu.pipeline_mode<synchronous>, transform_indices = @transform_5, window_bounds = array<i64: 32, 64>}, {pipeline_mode = #tpu.pipeline_mode<synchronous>, transform_indices = @transform_6, window_bounds = array<i64: 32, 1>}, {pipeline_mode = #tpu.pipeline_mode<synchronous>, transform_indices = @transform_7, window_bounds = array<i64: 2, 32>}, {pipeline_mode = #tpu.pipeline_mode<synchronous>, transform_indices = @transform_8, window_bounds = array<i64: 2, 1>}, {transform_indices = @transform_9, window_bounds = array<i64: 2, 128>}]} {
    %c0 = arith.constant 0 : index
    %c0_0 = arith.constant 0 : index
    %0 = vector.load %arg1[%c0, %c0_0] : memref<4x128xf32, #tpu.memory_space<vmem>>, vector<4x128xf32>
    %c0_1 = arith.constant 0 : index
    %c0_2 = arith.constant 0 : index
    %1 = vector.load %arg2[%c0_1, %c0_2] : memref<32x4xf32, #tpu.memory_space<vmem>>, vector<32x4xf32>
    %cst = arith.constant dense<0.000000e+00> : vector<32x128xf32>
    %2 = tpu.matmul %1, %0, %cst {dimension_numbers = #tpu.dot_dimension_numbers<[1], [0], [0], [1], [0, 0, 1, 1], [], []>} : vector<32x4xf32>, vector<4x128xf32>, vector<32x128xf32> -> vector<32x128xf32>
    %c0_3 = arith.constant 0 : index
    %c0_4 = arith.constant 0 : index
    %3 = vector.load %arg3[%c0_3, %c0_4] : memref<32x1xf32, #tpu.memory_space<vmem>>, vector<32x1xf32>
    %4 = vector.broadcast %3 : vector<32x1xf32> to vector<32x128xf32>
    %5 = arith.addf %2, %4 : vector<32x128xf32>
    %cst_5 = arith.constant 0.000000e+00 : f32
    %6 = vector.broadcast %cst_5 : f32 to vector<32x128xf32>
    %7 = arith.cmpf ogt, %5, %6 : vector<32x128xf32>
    %cst_6 = arith.constant 0.00999999977 : f32
    %8 = vector.broadcast %cst_6 : f32 to vector<32x128xf32>
    %9 = arith.mulf %8, %5 : vector<32x128xf32>
    %10 = arith.select %7, %5, %9 : vector<32x128xi1>, vector<32x128xf32>
    %c0_7 = arith.constant 0 : index
    %c0_8 = arith.constant 0 : index
    %11 = vector.load %arg4[%c0_7, %c0_8] : memref<64x32xf32, #tpu.memory_space<vmem>>, vector<64x32xf32>
    %cst_9 = arith.constant dense<0.000000e+00> : vector<64x128xf32>
    %12 = tpu.matmul %11, %10, %cst_9 {dimension_numbers = #tpu.dot_dimension_numbers<[1], [0], [0], [1], [0, 0, 1, 1], [], []>} : vector<64x32xf32>, vector<32x128xf32>, vector<64x128xf32> -> vector<64x128xf32>
    %c0_10 = arith.constant 0 : index
    %c0_11 = arith.constant 0 : index
    %13 = vector.load %arg5[%c0_10, %c0_11] : memref<64x1xf32, #tpu.memory_space<vmem>>, vector<64x1xf32>
    %14 = vector.broadcast %13 : vector<64x1xf32> to vector<64x128xf32>
    %15 = arith.addf %12, %14 : vector<64x128xf32>
    %cst_12 = arith.constant 0.000000e+00 : f32
    %16 = vector.broadcast %cst_12 : f32 to vector<64x128xf32>
    %17 = arith.cmpf ogt, %15, %16 : vector<64x128xf32>
    %cst_13 = arith.constant 0.00999999977 : f32
    %18 = vector.broadcast %cst_13 : f32 to vector<64x128xf32>
    %19 = arith.mulf %18, %15 : vector<64x128xf32>
    %20 = arith.select %17, %15, %19 : vector<64x128xi1>, vector<64x128xf32>
    %c0_14 = arith.constant 0 : index
    %c0_15 = arith.constant 0 : index
    %21 = vector.load %arg6[%c0_14, %c0_15] : memref<32x64xf32, #tpu.memory_space<vmem>>, vector<32x64xf32>
    %cst_16 = arith.constant dense<0.000000e+00> : vector<32x128xf32>
    %22 = tpu.matmul %21, %20, %cst_16 {dimension_numbers = #tpu.dot_dimension_numbers<[1], [0], [0], [1], [0, 0, 1, 1], [], []>} : vector<32x64xf32>, vector<64x128xf32>, vector<32x128xf32> -> vector<32x128xf32>
    %c0_17 = arith.constant 0 : index
    %c0_18 = arith.constant 0 : index
    %23 = vector.load %arg7[%c0_17, %c0_18] : memref<32x1xf32, #tpu.memory_space<vmem>>, vector<32x1xf32>
    %24 = vector.broadcast %23 : vector<32x1xf32> to vector<32x128xf32>
    %25 = arith.addf %22, %24 : vector<32x128xf32>
    %cst_19 = arith.constant 0.000000e+00 : f32
    %26 = vector.broadcast %cst_19 : f32 to vector<32x128xf32>
    %27 = arith.cmpf ogt, %25, %26 : vector<32x128xf32>
    %cst_20 = arith.constant 0.00999999977 : f32
    %28 = vector.broadcast %cst_20 : f32 to vector<32x128xf32>
    %29 = arith.mulf %28, %25 : vector<32x128xf32>
    %30 = arith.select %27, %25, %29 : vector<32x128xi1>, vector<32x128xf32>
    %c0_21 = arith.constant 0 : index
    %c0_22 = arith.constant 0 : index
    %31 = vector.load %arg8[%c0_21, %c0_22] : memref<2x32xf32, #tpu.memory_space<vmem>>, vector<2x32xf32>
    %cst_23 = arith.constant dense<0.000000e+00> : vector<2x128xf32>
    %32 = tpu.matmul %31, %30, %cst_23 {dimension_numbers = #tpu.dot_dimension_numbers<[1], [0], [0], [1], [0, 0, 1, 1], [], []>} : vector<2x32xf32>, vector<32x128xf32>, vector<2x128xf32> -> vector<2x128xf32>
    %c0_24 = arith.constant 0 : index
    %c0_25 = arith.constant 0 : index
    %33 = vector.load %arg9[%c0_24, %c0_25] : memref<2x1xf32, #tpu.memory_space<vmem>>, vector<2x1xf32>
    %34 = vector.broadcast %33 : vector<2x1xf32> to vector<2x128xf32>
    %35 = arith.addf %32, %34 : vector<2x128xf32>
    %c0_26 = arith.constant 0 : index
    %c0_27 = arith.constant 0 : index
    %36 = vector.load %arg10[%c0_26, %c0_27] : memref<2x128xf32, #tpu.memory_space<vmem>>, vector<2x128xf32>
    tpu.vector_store %arg10[%c0_26, %c0_27], %35 {strides = array<i32>} : memref<2x128xf32, #tpu.memory_space<vmem>>, vector<2x128xf32>,
    return
  }
  func.func @transform_0(%arg0: i32) -> (i32, i32) {
    %c0_i32 = arith.constant 0 : i32
    %c0_i32_0 = arith.constant 0 : i32
    return %c0_i32, %arg0 : i32, i32
  }
  func.func @transform_1(%arg0: i32) -> (i32, i32) {
    %c0_i32 = arith.constant 0 : i32
    %c0_i32_0 = arith.constant 0 : i32
    %c0_i32_1 = arith.constant 0 : i32
    return %c0_i32, %c0_i32_0 : i32, i32
  }
  func.func @transform_2(%arg0: i32) -> (i32, i32) {
    %c0_i32 = arith.constant 0 : i32
    %c0_i32_0 = arith.constant 0 : i32
    %c0_i32_1 = arith.constant 0 : i32
    return %c0_i32, %c0_i32_0 : i32, i32
  }
  func.func @transform_3(%arg0: i32) -> (i32, i32) {
    %c0_i32 = arith.constant 0 : i32
    %c0_i32_0 = arith.constant 0 : i32
    %c0_i32_1 = arith.constant 0 : i32
    return %c0_i32, %c0_i32_0 : i32, i32
  }
  func.func @transform_4(%arg0: i32) -> (i32, i32) {
    %c0_i32 = arith.constant 0 : i32
    %c0_i32_0 = arith.constant 0 : i32
    %c0_i32_1 = arith.constant 0 : i32
    return %c0_i32, %c0_i32_0 : i32, i32
  }
  func.func @transform_5(%arg0: i32) -> (i32, i32) {
    %c0_i32 = arith.constant 0 : i32
    %c0_i32_0 = arith.constant 0 : i32
    %c0_i32_1 = arith.constant 0 : i32
    return %c0_i32, %c0_i32_0 : i32, i32
  }
  func.func @transform_6(%arg0: i32) -> (i32, i32) {
    %c0_i32 = arith.constant 0 : i32
    %c0_i32_0 = arith.constant 0 : i32
    %c0_i32_1 = arith.constant 0 : i32
    return %c0_i32, %c0_i32_0 : i32, i32
  }
  func.func @transform_7(%arg0: i32) -> (i32, i32) {
    %c0_i32 = arith.constant 0 : i32
    %c0_i32_0 = arith.constant 0 : i32
    %c0_i32_1 = arith.constant 0 : i32
    return %c0_i32, %c0_i32_0 : i32, i32
  }
  func.func @transform_8(%arg0: i32) -> (i32, i32) {
    %c0_i32 = arith.constant 0 : i32
    %c0_i32_0 = arith.constant 0 : i32
    %c0_i32_1 = arith.constant 0 : i32
    return %c0_i32, %c0_i32_0 : i32, i32
  }
  func.func @transform_9(%arg0: i32) -> (i32, i32) {
    %c0_i32 = arith.constant 0 : i32
    %c0_i32_0 = arith.constant 0 : i32
    return %c0_i32, %arg0 : i32, i32
  }
}

</mosaic_0001>

<bundles_post_ra>
// kernel: tpu_custom_call.1
= control target key start
LH: loop header
LB: loop body
LE: loop exit
PB: predicated region body
PF: predicated region fallthrough
CT: control target
= control target key end

     0   :  { %14 = vsyncpa [#allocation3], 0  ;;  %s1468_s0 = inlined_call_operand.vmem [shape: f32[4,512], index: 0, kind: input, shape index: {}]   ;;  %s1469_s1 = inlined_call_operand.vmem [shape: f32[32,4], index: 1, kind: input, shape index: {}]   ;;  %s1470_s2 = inlined_call_operand.vmem [shape: f32[32,1], index: 2, kind: input, shape index: {}]   ;;  %s1471_s3 = inlined_call_operand.vmem [shape: f32[64,32], index: 3, kind: input, shape index: {}]   ;;  %s1472_s4 = inlined_call_operand.vmem [shape: f32[64,1], index: 4, kind: input, shape index: {}]   ;;  %s1473_s5 = inlined_call_operand.vmem [shape: f32[32,64], index: 5, kind: input, shape index: {}]   ;;  %s1474_s6 = inlined_call_operand.vmem [shape: f32[32,1], index: 6, kind: input, shape index: {}]   ;;  %s1475_s7 = inlined_call_operand.vmem [shape: f32[2,32], index: 7, kind: input, shape index: {}]   ;;  %s1476_s8 = inlined_call_operand.vmem [shape: f32[2,1], index: 8, kind: input, shape index: {}]   ;;  %s1477_s9 = inlined_call_operand.hbm [shape: f32[2,512], index: 9, kind: output, shape index: {}]  }
   0x1   :  { %16 = vsyncpa [#allocation3 + $0x1], 0  ;;  %s1256_s30 = smov 0   ;;  %s1258_s10 = smov 0  }
   0x2   :  { %s1260_s11 = smov 0   ;;  %s1262_s12 = smov 0  }
   0x3 LB: > { %s1277_s13 = sadd.s32 4294967295, %s1200_s12   ;;  %s973_s14 = sadd.s32 4294967294, %s1200_s12   ;;  %s1200_s12 = sphi %s1262_s12, %s1483_s12   ;;  %s1196_s11 = sphi %s1260_s11, %s1482_s11   ;;  %s1192_s10 = sphi %s1258_s10, %s1481_s10   ;;  %s1188_s30 = sphi %s1256_s30, %s1480_s30  }
   0x4   : > { %s1281_s15 = sadd.s32 1, %s1200_s12   ;;  %s223_s16 = sadd.s32 1, %s1196_s11 }
   0x5   : > { %s220_s17 = ssub.s32 %s1200_s12, %s1281_s15  ;;  %p233_p0 = scmp.ne.s32.totalorder %s1196_s11, %s1192_s10 }
   0x6   : > { %p221_p1 = scmp.eq.s32.totalorder %s220_s17, 0  ;;  %p234_p2 = scmp.eq.s32.totalorder %s1277_s13, 3 }
   0x7   : > { %p239_p3 = scmp.ne.s32.totalorder %s1192_s10, %s1188_s30  ;;  %p240_p4 = scmp.eq.s32.totalorder %s973_s14, 3 }
   0x8   : > { %s1292_s18 = scalar_select %p221_p1, %s1196_s11, %s223_s16  }
   0x9   : > { %p1294_p5 = por %p234_p2, %p233_p0  ;;  %p1298_p6 = por %p240_p4, %p239_p3 }
   0xa   : > { %p976_p7 = scmp.ge.s32.totalorder %s1200_s12, 1  ;;  %p289_p8 = scmp.lt.s32.totalorder %s1200_s12, 5 }
   0xc   : > { %p290_p9 = pnand %p976_p7, %p289_p8 }
   0xd   : > { %p324_p10 = scmp.lt.s32.totalorder (!%p290_p9), %s1277_s13, 3  ;;  %s321_s22 = sand.u32 (!%p290_p9), 1, %s1192_s10  }
   0xe   : > { %293 = sbr.rel (%p290_p9) target bundleno = 879 (0x36f), region = 56  ;;  %s977_s23 = sshll.u32 (!%p290_p9), %s321_s22, 1 }
   0xf   : > { %s998_s24 = sshll.u32 (!%p290_p9), %s1277_s13, 5  ;;  %s323_s26 = scalar_lea.vmem (!%p290_p9), [#allocation2], %s977_s23 }
  0x10   : > { %s1433_s14 = scalar_lea.hbm (!%p290_p9), %s1477_s9, %s998_s24 }
  0x13   : > { %v329_v0 = vld [vmem:[%s1469_s1] sm:$0xff]  ;;  %vm357_vm0 = vcmask 31744   ;;  %v336_v1 = vld [vmem:[%s1470_s2 + $0x18] sm:$0xff]  ;;  %s325_s25 = scalar_select %p324_p10, %s1277_s13, 3  ;;  %v1202_v2 = vmov 0   ;;  %v334_v3 = vld [vmem:[%s1470_s2 + $0x8] sm:$0xff] }
  0x14   : > { %1037 = vmatprep.mubr.msk.f32.mxu0 %vm357_vm0, %v329_v0  ;;  %1138 = vset.pattern.permute.xlu0 %v1202_v2  ;;  %vm370_vm1 = vcmask 1043456   ;;  %v335_v4 = vld [vmem:[%s1470_s2 + $0x10] sm:$0xff]  ;;  %v333_v5 = vld [vmem:[%s1470_s2] sm:$0xff]  ;;  %v330_v7 = vld [vmem:[%s1469_s1 + $0x8] sm:$0xff]  ;;  %vm527_vm2 = vcmask 261120   ;;  %vm709_vm7 = vcmask 523264  }
  0x15   : > { %1139 = vset.pattern.permute.xlu1 %v1202_v2  ;;  %354 = vperm.xlu0 %1138, %v336_v1   ;;  %s978_s28 = sshll.u32 %s325_s25, 2  ;;  %v331_v8 = vld [vmem:[%s1469_s1 + $0x10] sm:$0xff]  ;;  %v486_v9 = vld [vmem:[%s1472_s4 + $0x38] sm:$0xff]  ;;  %v484_v12 = vld [vmem:[%s1472_s4 + $0x28] sm:$0xff]  ;;  %s914_s25 = sshll.u32 %s323_s26, 4  ;;  %s915_s25 = int_to_ptr.vmem [resolvable:$true] %s914_s25 }
  0x16   : > { %344 = vperm.xlu1 %1139, %v334_v3   ;;  %s327_s21 = scalar_lea.vmem %s1468_s0, %s978_s28  ;;  %v485_v10 = vld [vmem:[%s1472_s4 + $0x30] sm:$0xff]  ;;  %v332_v11 = vld [vmem:[%s1469_s1 + $0x18] sm:$0xff]  ;;  %v483_v13 = vld [vmem:[%s1472_s4 + $0x20] sm:$0xff]  ;;  %s901_s28 = scalar_lea.sflag [#allocation3], %s321_s22 }
  0x17   : > { %v328_v6 = vld [vmem:[%s327_s21] sm:$0xf]  ;;  %v482_v14 = vld [vmem:[%s1472_s4 + $0x18] sm:$0xff]  ;;  %v481_v15 = vld [vmem:[%s1472_s4 + $0x10] sm:$0xff]  ;;  %s1140_s16 = scalar_lea.vmem %s915_s25, 32  ;;  %s1205_s13 = smov [#allocation2]  }
  0x18   : > { %1035 = vmatprep.subr.msk.mxu0 %vm370_vm1, %v328_v6  ;;  %v480_v16 = vld [vmem:[%s1472_s4 + $0x8] sm:$0xff]  ;;  %v479_v17 = vld [vmem:[%s1472_s4] sm:$0xff]  ;;  %v688_v18 = vld [vmem:[%s1474_s6 + $0x18] sm:$0xff]  ;;  %p1141_p11 = scmp.ne.s32.totalorder %s915_s25, %s1140_s16  ;;  %s1144_s17 = sshll.u32 %s1205_s13, 4  ;;  %s1145_s17 = int_to_ptr.vmem [resolvable:$false] %s1144_s17 }
  0x19   : > { %349 = vperm.xlu0 %1138, %v335_v4   ;;  %1036 = vmatpush3.msk.msra.mxu0 %vm370_vm1, %v328_v6  ;;  %v687_v19 = vld [vmem:[%s1474_s6 + $0x10] sm:$0xff]  ;;  %v686_v20 = vld [vmem:[%s1474_s6 + $0x8] sm:$0xff]  ;;  %v685_v21 = vld [vmem:[%s1474_s6] sm:$0xff]  ;;  %s1146_s21 = scalar_lea.vmem %s1145_s17, 64  ;;  %p1147_p0 = scmp.lt.s32.totalorder %s915_s25, %s1145_s17 }
  0x1a   : > { %339 = vperm.xlu1 %1139, %v333_v5   ;;  %1038 = vmatmul.mubr.msk.f32.vlgmr.msra.gmra.mxu0 %vm357_vm0, %v330_v7  ;;  %v820_v22 = vld [vmem:[%s1476_s8] sm:$0x3]  ;;  %v472_v44 = vld [vmem:[%s1471_s3 + $0x8] sm:$0xff]  ;;  %v473_v45 = vld [vmem:[%s1471_s3 + $0x10] sm:$0xff]  ;;  %p1142_p12 = pnand %p1141_p11, %p1294_p5  ;;  %p1148_p1 = scmp.lt.s32.totalorder %s1146_s21, %s1140_s16 }
  0x1b   : > { %1040 = vmatprep.mubr.msk.f32.mxu0 %vm357_vm0, %v331_v8  ;;  %v471_v23 = vld [vmem:[%s1471_s3] sm:$0xff]  ;;  %v474_v46 = vld [vmem:[%s1471_s3 + $0x18] sm:$0xff]  ;;  %v476_v48 = vld [vmem:[%s1471_s3 + $0x28] sm:$0xff] }
  0x1c   : > { %1051 = vmatprep.mubr.msk.f32.mxu1 %vm527_vm2, %v471_v23  ;;  %v475_v47 = vld [vmem:[%s1471_s3 + $0x20] sm:$0xff]  ;;  %v477_v49 = vld [vmem:[%s1471_s3 + $0x30] sm:$0xff]  ;;  %v478_v50 = vld [vmem:[%s1471_s3 + $0x38] sm:$0xff]  ;;  %p1143_p13 = pneg %p1142_p12  ;;  %p1149_p2 = por %p1148_p1, %p1147_p0 }
  0x1d   : > { %524 = vperm.xlu0 %1138, %v486_v9   ;;  %v681_v51 = vld [vmem:[%s1473_s5] sm:$0xff] }
  0x1e   : > { %519 = vperm.xlu1 %1139, %v485_v10   ;;  %1041 = vmatmul.mubr.msk.f32.gmra.mxu0 %vm357_vm0, %v332_v11  ;;  %vm1204_vm0 = vmmov 0   ;;  %p1150_p3 = pnand %p1149_p2, %p1143_p13 }
  0x1f   : > { %1079 = vmatprep.mubr.msk.f32.mxu0 %vm709_vm7, %v681_v51  ;;  %v819_v51 = vld [vmem:[%s1475_s7] sm:$0x3] }
  0x21   : > { %514 = vperm.xlu0 %1138, %v484_v12  }
  0x22   : > { %509 = vperm.xlu1 %1139, %v483_v13  }
  0x25   : > { %504 = vperm.xlu0 %1138, %v482_v14  }
  0x26   : > { %499 = vperm.xlu1 %1139, %v481_v15  }
  0x29   : > { %494 = vperm.xlu0 %1138, %v480_v16  }
  0x2a   : > { %489 = vperm.xlu1 %1139, %v479_v17  }
  0x2d   : > { %706 = vperm.xlu0 %1138, %v688_v18  }
  0x2e   : > { %701 = vperm.xlu1 %1139, %v687_v19  }
  0x31   : > { %696 = vperm.xlu0 %1138, %v686_v20  }
  0x32   : > { %691 = vperm.xlu1 %1139, %v685_v21  }
  0x35   : > { %823 = vperm.xlu0 %1138, %v820_v22  }
  0x90   : > { %v355_v24 = vpop.permute.xlu0 %354 }
  0x91   : > { %v345_v25 = vpop.permute.xlu1 %344 }
  0x94   : > { %v350_v29 = vpop.permute.xlu0 %349 }
  0x95   : > { %v340_v32 = vpop.permute.xlu1 %339 }
  0x98   : > { %v525_v53 = vpop.permute.xlu0 %524 }
  0x99   : > { %v520_v55 = vpop.permute.xlu1 %519 }
  0x9c   : > { %v515_v58 = vpop.permute.xlu0 %514 }
  0x9d   : > { %v510_v60 = vpop.permute.xlu1 %509 }
  0xa0   : > { %v505_v1 = vpop.permute.xlu0 %504 }
  0xa1   : > { %v500_v6 = vpop.permute.xlu1 %499 }
  0xa4   : > { %v495_v14 = vpop.permute.xlu0 %494 }
  0xa5   : > { %v490_v18 = vpop.permute.xlu1 %489 }
  0xda   : > { %v1039_v26 = vpop.f32.mrf.mxu0 }
  0xdb   : > { %v446_v30 = vadd.f32 %v1039_v26, %v345_v25 }
  0xdc   : > { %v440_v27 = vpop.f32.mrf.mxu0 }
  0xdd   : > { %v441_v34 = vadd.f32 %v440_v27, %v340_v32  ;;  %v464_v37 = vmul.f32 0.01, %v446_v30  ;;  %vm460_vm5 = vcmp.gt.f32.partialorder %v446_v30, 0.0  ;;  %v707_v32 = vpop.permute.xlu0 %706 }
  0xde   : > { %v1042_v28 = vpop.f32.mrf.mxu0 }
  0xdf   : > { %v456_v31 = vadd.f32 %v1042_v28, %v355_v24  ;;  %v463_v40 = vmul.f32 0.01, %v441_v34  ;;  %vm459_vm6 = vcmp.gt.f32.partialorder %v441_v34, 0.0  ;;  %v468_v42 = vsel %vm460_vm5, %v446_v30, %v464_v37  ;;  %v682_v28 = vld [vmem:[%s1473_s5 + $0x8] sm:$0xff]  ;;  %v684_v30 = vld [vmem:[%s1473_s5 + $0x18] sm:$0xff] }
  0xe0   : > { %v450_v33 = vpop.f32.mrf.mxu0 }
  0xe1   : > { %v451_v35 = vadd.f32 %v450_v33, %v350_v29  ;;  %vm462_vm3 = vcmp.gt.f32.partialorder %v456_v31, 0.0  ;;  %v466_v36 = vmul.f32 0.01, %v456_v31  ;;  %v467_v43 = vsel %vm459_vm6, %v441_v34, %v463_v40  ;;  %v683_v29 = vld [vmem:[%s1473_s5 + $0x10] sm:$0xff]  ;;  %v702_v33 = vpop.permute.xlu1 %701 }
  0xe3   : > { %v465_v38 = vmul.f32 0.01, %v451_v35  ;;  %v470_v39 = vsel %vm462_vm3, %v456_v31, %v466_v36  ;;  %vm461_vm4 = vcmp.gt.f32.partialorder %v451_v35, 0.0  ;;  %v1203_v31 = vmov 0.0   ;;  %v697_v36 = vpop.permute.xlu0 %696 }
  0xe4   : > { %1043 = vmatprep.subr.mxu1 %v470_v39 }
  0xe5   : > { %1044 = vmatpush3.msra.mxu1 %v470_v39  ;;  %v469_v41 = vsel %vm461_vm4, %v451_v35, %v465_v38  ;;  %v692_v40 = vpop.permute.xlu1 %691 }
  0xe6   : > { %1045 = vmatprep.subr.mxu1 %v469_v41 }
  0xe7   : > { %1046 = vmatpush3.msra.mxu1 %v469_v41 }
  0xe8   : > { %1047 = vmatprep.subr.mxu1 %v468_v42 }
  0xe9   : > { %1048 = vmatpush3.msra.mxu1 %v468_v42 }
  0xea   : > { %1049 = vmatprep.subr.mxu1 %v467_v43 }
  0xeb   : > { %1050 = vmatpush3.msra.mxu1 %v467_v43 }
  0xec   : > { %1052 = vmatmul.mubr.msk.f32.vlgmr.msra.gmra.mxu1 %vm527_vm2, %v472_v44  ;;  %1085 = vmatprep.subr.mxu1 %v1203_v31 }
  0xed   : > { %1054 = vmatprep.mubr.msk.f32.mxu1 %vm527_vm2, %v473_v45 }
  0xf0   : > { %1055 = vmatmul.mubr.msk.f32.gmra.mxu1 %vm527_vm2, %v474_v46 }
  0xf1   : > { %1057 = vmatprep.mubr.msk.f32.mxu1 %vm527_vm2, %v475_v47 }
  0xf4   : > { %1058 = vmatmul.mubr.msk.f32.gmra.mxu1 %vm527_vm2, %v476_v48 }
  0xf5   : > { %1060 = vmatprep.mubr.msk.f32.mxu1 %vm527_vm2, %v477_v49 }
  0xf8   : > { %1061 = vmatmul.mubr.msk.f32.gmra.mxu1 %vm527_vm2, %v478_v50 }
  0xf9   : > { %1093 = vmatprep.mubr.msk.f32.mxu1 %vm1204_vm0, %v1203_v31 }
 0x1ac   : > { %v1053_v52 = vpop.f32.mrf.mxu1 }
 0x1ad   : > { %v624_v15 = vadd.f32 %v1053_v52, %v495_v14 }
 0x1ae   : > { %v618_v54 = vpop.f32.mrf.mxu1 }
 0x1af   : > { %v619_v19 = vadd.f32 %v618_v54, %v490_v18  ;;  %v666_v22 = vmul.f32 0.01, %v624_v15  ;;  %vm658_vm14 = vcmp.gt.f32.partialorder %v624_v15, 0.0 }
 0x1b0   : > { %v1056_v56 = vpop.f32.mrf.mxu1 }
 0x1b1   : > { %v634_v7 = vadd.f32 %v1056_v56, %v505_v1  ;;  %v665_v24 = vmul.f32 0.01, %v619_v19  ;;  %vm657_vm15 = vcmp.gt.f32.partialorder %v619_v19, 0.0  ;;  %v674_v26 = vsel %vm658_vm14, %v624_v15, %v666_v22 }
 0x1b2   : > { %v628_v57 = vpop.f32.mrf.mxu1 }
 0x1b3   : > { %v629_v11 = vadd.f32 %v628_v57, %v500_v6  ;;  %v668_v16 = vmul.f32 0.01, %v634_v7  ;;  %vm660_vm12 = vcmp.gt.f32.partialorder %v634_v7, 0.0  ;;  %v673_v27 = vsel %vm657_vm15, %v619_v19, %v665_v24 }
 0x1b4   : > { %v1059_v59 = vpop.f32.mrf.mxu1 }
 0x1b5   : > { %v644_v63 = vadd.f32 %v1059_v59, %v515_v58  ;;  %v667_v20 = vmul.f32 0.01, %v629_v11  ;;  %vm659_vm13 = vcmp.gt.f32.partialorder %v629_v11, 0.0  ;;  %v676_v23 = vsel %vm660_vm12, %v634_v7, %v668_v16 }
 0x1b6   : > { %v638_v61 = vpop.f32.mrf.mxu1 }
 0x1b7   : > { %v639_v3 = vadd.f32 %v638_v61, %v510_v60  ;;  %v670_v8 = vmul.f32 0.01, %v644_v63  ;;  %vm662_vm10 = vcmp.gt.f32.partialorder %v644_v63, 0.0  ;;  %v675_v25 = vsel %vm659_vm13, %v629_v11, %v667_v20 }
 0x1b8   : > { %v1062_v62 = vpop.f32.mrf.mxu1 }
 0x1b9   : > { %v654_v0 = vadd.f32 %v1062_v62, %v525_v53  ;;  %v669_v12 = vmul.f32 0.01, %v639_v3  ;;  %vm661_vm11 = vcmp.gt.f32.partialorder %v639_v3, 0.0  ;;  %v678_v17 = vsel %vm662_vm10, %v644_v63, %v670_v8  ;;  %v824_v53 = vpop.permute.xlu0 %823 }
 0x1ba   : > { %v648_v2 = vpop.f32.mrf.mxu1 }
 0x1bb   : > { %v672_v4 = vmul.f32 0.01, %v654_v0  ;;  %v649_v5 = vadd.f32 %v648_v2, %v520_v55  ;;  %vm664_vm8 = vcmp.gt.f32.partialorder %v654_v0, 0.0  ;;  %v677_v21 = vsel %vm661_vm11, %v639_v3, %v669_v12 }
 0x1bd   : > { %v671_v9 = vmul.f32 0.01, %v649_v5  ;;  %v680_v10 = vsel %vm664_vm8, %v654_v0, %v672_v4  ;;  %vm663_vm9 = vcmp.gt.f32.partialorder %v649_v5, 0.0 }
 0x1be   : > { %1063 = vmatprep.subr.mxu0 %v680_v10 }
 0x1bf   : > { %1064 = vmatpush3.msra.mxu0 %v680_v10  ;;  %v679_v13 = vsel %vm663_vm9, %v649_v5, %v671_v9 }
 0x1c0   : > { %1065 = vmatprep.subr.mxu0 %v679_v13 }
 0x1c1   : > { %1066 = vmatpush3.msra.mxu0 %v679_v13 }
 0x1c2   : > { %1067 = vmatprep.subr.mxu0 %v678_v17 }
 0x1c3   : > { %1068 = vmatpush3.msra.mxu0 %v678_v17 }
 0x1c4   : > { %1069 = vmatprep.subr.mxu0 %v677_v21 }
 0x1c5   : > { %1070 = vmatpush3.msra.mxu0 %v677_v21 }
 0x1c6   : > { %1071 = vmatprep.subr.mxu0 %v676_v23 }
 0x1c7   : > { %1072 = vmatpush3.msra.mxu0 %v676_v23 }
 0x1c8   : > { %1073 = vmatprep.subr.mxu0 %v675_v25 }
 0x1c9   : > { %1074 = vmatpush3.msra.mxu0 %v675_v25 }
 0x1ca   : > { %1075 = vmatprep.subr.mxu0 %v674_v26 }
 0x1cb   : > { %1076 = vmatpush3.msra.mxu0 %v674_v26 }
 0x1cc   : > { %1077 = vmatprep.subr.mxu0 %v673_v27 }
 0x1cd   : > { %1078 = vmatpush3.msra.mxu0 %v673_v27 }
 0x1ce   : > { %1080 = vmatmul.mubr.msk.f32.vlgmr.msra.gmra.mxu0 %vm709_vm7, %v682_v28 }
 0x1cf   : > { %1082 = vmatprep.mubr.msk.f32.mxu0 %vm709_vm7, %v683_v29 }
 0x1d2   : > { %1083 = vmatmul.mubr.msk.f32.gmra.mxu0 %vm709_vm7, %v684_v30 }
 0x28e   : > { %v1081_v34 = vpop.f32.mrf.mxu0 }
 0x28f   : > { %v794_v38 = vadd.f32 %v1081_v34, %v697_v36 }
 0x290   : > { %v788_v35 = vpop.f32.mrf.mxu0 }
 0x291   : > { %v789_v42 = vadd.f32 %v788_v35, %v692_v40  ;;  %v812_v45 = vmul.f32 0.01, %v794_v38  ;;  %vm808_vm4 = vcmp.gt.f32.partialorder %v794_v38, 0.0 }
 0x292   : > { %v1084_v37 = vpop.f32.mrf.mxu0 }
 0x293   : > { %v804_v39 = vadd.f32 %v1084_v37, %v707_v32  ;;  %v811_v48 = vmul.f32 0.01, %v789_v42  ;;  %vm807_vm5 = vcmp.gt.f32.partialorder %v789_v42, 0.0  ;;  %v816_v50 = vsel %vm808_vm4, %v794_v38, %v812_v45 }
 0x294   : > { %v798_v41 = vpop.f32.mrf.mxu0 }
 0x295   : > { %vm810_vm1 = vcmp.gt.f32.partialorder %v804_v39, 0.0  ;;  %v814_v43 = vmul.f32 0.01, %v804_v39  ;;  %v799_v44 = vadd.f32 %v798_v41, %v702_v33  ;;  %v815_v52 = vsel %vm807_vm5, %v789_v42, %v811_v48 }
 0x297   : > { %vm809_vm3 = vcmp.gt.f32.partialorder %v799_v44, 0.0  ;;  %v813_v46 = vmul.f32 0.01, %v799_v44  ;;  %v818_v47 = vsel %vm810_vm1, %v804_v39, %v814_v43 }
 0x298   : > { %1086 = vmatpush3.msra.mxu1 %v818_v47 }
 0x299   : > { %1087 = vmatprep.subr.mxu1 %v1203_v31  ;;  %v817_v49 = vsel %vm809_vm3, %v799_v44, %v813_v46 }
 0x29a   : > { %1088 = vmatpush3.msra.mxu1 %v817_v49 }
 0x29b   : > { %1089 = vmatprep.subr.mxu1 %v1203_v31 }
 0x29c   : > { %1090 = vmatpush3.msra.mxu1 %v816_v50 }
 0x29d   : > { %1091 = vmatprep.subr.mxu1 %v1203_v31 }
 0x29e   : > { %1092 = vmatpush3.msra.mxu1 %v815_v52 }
 0x29f   : > { %1094 = vmatmul.mubr.msk.f32.vlgmr.msra.gmra.mxu1 %vm527_vm2, %v819_v51 }
 0x35f   : > { %v895_v54 = vpop.f32.mrf.mxu1 }
 0x360   : > { %v896_v55 = vadd.f32 %v895_v54, %v824_v53 }
 0x361   : > { %v1095_v56 = vpop.f32.mrf.mxu1 }
 0x362   : > { %899 = vst [vmem:[%s323_s26] sm:$0x3] %v896_v55 }
 0x363   : > { %1153 = shalt.err (!%p1150_p3)
}
 0x364   : > { %s1154_s23 = scalar_lea.hbm %s1433_s14, 32  ;;  %s1158_s26 = scalar_lea.hbm %s1477_s9, 128 }
 0x365   : > { %p1155_p4 = scmp.ne.s32.totalorder %s1433_s14, %s1154_s23  ;;  %p1159_p9 = scmp.lt.s32.totalorder %s1433_s14, %s1477_s9 }
 0x366   : > { %p1160_p10 = scmp.lt.s32.totalorder %s1158_s26, %s1154_s23 }
 0x367   : > { %p1156_p7 = pnand %p1155_p4, %p1294_p5 }
 0x368   : > { %p1161_p11 = por %p1160_p10, %p1159_p9 }
 0x369   : > { %p1157_p8 = pneg %p1156_p7 }
 0x36b   : > { %p1162_p12 = pnand %p1161_p11, %p1157_p8 }
 0x36d   : > { %1165 = shalt.err (!%p1162_p12)
}
 0x36e   : > { %1096 = dma.vmem_to_hbm [thread:$0]  (%p1294_p5), %s915_s25, 32, %s1433_s14, %s901_s28  }
 0x36f PF: > { %p1102_p13 = scmp.ge.s32.totalorder %s1200_s12, 2  ;;  %s926_s16 = sand.u32 1, %s1188_s30  }
 0x370   : > { %s927_s13 = scalar_lea.sflag [#allocation3], %s926_s16 }
 0x371   : > { %p1099_p0 = pnand %p1102_p13, %p1298_p6 }
 0x373   : > { %p1100_p1 = pneg %p1099_p0 }
 0x375   : > { %1183 = dma.done.wait (%p1100_p1), %s927_s13, 32  }
 0x376   : > { %1185 = vsyncadd (%p1100_p1), %s927_s13, 4294967264  ;;  %p19_p2 = scmp.ge.s32.totalorder %s1281_s15, 6   ;;  %s1480_s30 = smov %s1192_s10 }
 0x377   : > { %s1481_s10 = smov %s1196_s11  ;;  %s1482_s11 = smov %s1292_s18 }
 0x378   : > { %s1483_s12 = smov %s1281_s15  ;;  %21 = sbr.rel (!%p19_p2) target bundleno = 3 (0x3), region = 91 }
 0x37d   :  { %932 = vsyncpa [#allocation3], 1 }
 0x37e   :  { %934 = vsyncpa [#allocation3 + $0x1], 1 }

</bundles_post_ra>
